<compile_context>
chip_gen: v5e
topology: v5e:2x2
jax: 0.10.0
libtpu: 0.0.40
codegen_flags: <defaults>
</compile_context>

<pallas_src>
import functools

import jax
import jax.numpy as jnp
from jax import lax
from jax.experimental import pallas as pl
from jax.experimental.pallas import tpu as pltpu

_LANES = 128
_PACKED_MAX_C = 16   # butterfly cost grows with log2(C); rows kernel is fine above


def _round_up(x, m):
    return ((x + m - 1) // m) * m


def _sublane_granule(dtype):
    # (8,128) f32 native tile; sub-32-bit dtypes pack along sublanes (16 bf16, 32 i8).
    return max(8, 32 // jnp.dtype(dtype).itemsize)


@functools.lru_cache(maxsize=None)
def _vmem_params():
    """(per-input-block byte budget, scoped vmem_limit_bytes), per TPU generation."""
    cap = 64 * 1024 * 1024                     # conservative default: v7x per-TC VMEM
    try:
        info = pltpu.get_tpu_info()
        got = getattr(info, "vmem_capacity_bytes", None)
        if got:
            cap = int(got)
    except Exception:
        pass
    if cap >= 96 * 1024 * 1024:                # v5e / v6e: 128 MiB VMEM
        budget, limit = 8 * 1024 * 1024, 100 * 1024 * 1024
    else:                                      # v7x: 64 MiB VMEM
        budget, limit = 5 * 1024 * 1024, 52 * 1024 * 1024
    return budget, min(limit, int(cap * 0.85))


def _block_budget():
    return _vmem_params()[0]


def _vmem_limit():
    return _vmem_params()[1]


def _choose_tile(total, bytes_per_unit, granule, min_steps=2):
    """Largest tile the per-block VMEM budget allows (rounded to `granule`)
    -- bigger blocks => higher fraction of HBM roofline -- while keeping at
    least `min_steps` grid steps when the extent permits, so v7x's two
    TensorCores are both used and DMA/compute can overlap."""
    t = max(_block_budget() // max(bytes_per_unit, 1), granule)
    if total > min_steps * granule:
        t = min(t, _round_up(pl.cdiv(total, min_steps), granule))
    t = min(t, total)
    t = max((t // granule) * granule, granule)
    if t >= total:
        return total                           # full extent is always a legal block
    return t


# ----------------------------------------------------------------------------
# Kernel bodies
# ----------------------------------------------------------------------------
def _ln_rows_kernel(x_ref, w_ref, b_ref, o_ref, *, eps):
    # channels_last, generic: x_ref (T, C), reduce over lanes (last axis).
    x = x_ref[...].astype(jnp.float32)
    mean = jnp.mean(x, axis=-1, keepdims=True)
    xc = x - mean
    var = jnp.mean(xc * xc, axis=-1, keepdims=True)
    inv = lax.rsqrt(var + eps)
    y = xc * inv * w_ref[...].astype(jnp.float32) + b_ref[...].astype(jnp.float32)
    o_ref[...] = y.astype(o_ref.dtype)


def _ln_packed_kernel(x_ref, w_ref, b_ref, o_ref, *, eps, c):
    # channels_last, small C, lane-dense: x_ref (T, 128); each 128-lane row holds
    # 128 // c complete, aligned channel groups.  Per-group sums via a log2(c)
    # XOR-butterfly of XLU rolls + VPU selects -- exact f32, no MXU involvement.
    x = x_ref[...].astype(jnp.float32)
    n = x.shape[-1]
    lane = lax.broadcasted_iota(jnp.int32, x.shape, 1)
    # One-roll probe: 1 iff pltpu.roll follows the np.roll convention
    # (out[j] = in[(j - shift) % n]).  Makes the butterfly convention-agnostic.
    np_conv = (pltpu.roll(lane, n - 1, 1) == ((lane + 1) & (n - 1))).astype(jnp.int32)

    def group_sum(v):
        s = 1
        while s < c:
            a = pltpu.roll(v, n - s, 1)        # v[j + s] under np convention
            b = pltpu.roll(v, s, 1)            # v[j - s] under np convention
            want_plus = ((lane & s) == 0).astype(jnp.int32)   # XOR partner is j + s
            v = v + jnp.where(np_conv == want_plus, a, b)
            s *= 2
        return v

    inv_c = 1.0 / c
    mean = group_sum(x) * inv_c
    xc = x - mean
    var = group_sum(xc * xc) * inv_c
    inv = lax.rsqrt(var + eps)
    y = xc * inv * w_ref[...].astype(jnp.float32) + b_ref[...].astype(jnp.float32)
    o_ref[...] = y.astype(o_ref.dtype)


def _ln_cf_lane_kernel(x_ref, w_ref, b_ref, o_ref, *, eps):
    # channels_first, HW % 128 == 0: x_ref (C, T, 128); reduce over the leading
    # C axis -- plain VPU adds across full-density (T, 128) vregs.
    x = x_ref[...].astype(jnp.float32)
    mean = jnp.mean(x, axis=0, keepdims=True)          # (1, T, 128)
    xc = x - mean
    var = jnp.mean(xc * xc, axis=0, keepdims=True)
    inv = lax.rsqrt(var + eps)
    w = w_ref[...].astype(jnp.float32)                 # (C, 1, 1)
    b = b_ref[...].astype(jnp.float32)
    o_ref[...] = (xc * inv * w + b).astype(o_ref.dtype)


def _ln_cols_kernel(x_ref, w_ref, b_ref, o_ref, *, eps):
    # channels_first fallback: x_ref (C, T), reduce over sublanes (axis 0).
    x = x_ref[...].astype(jnp.float32)
    mean = jnp.mean(x, axis=0, keepdims=True)
    xc = x - mean
    var = jnp.mean(xc * xc, axis=0, keepdims=True)
    inv = lax.rsqrt(var + eps)
    w = w_ref[...].astype(jnp.float32)                 # (C, 1)
    b = b_ref[...].astype(jnp.float32)
    o_ref[...] = (xc * inv * w + b).astype(o_ref.dtype)


# ----------------------------------------------------------------------------
# Wrappers
# ----------------------------------------------------------------------------
def _layer_norm_rows(x2d, weight, bias, eps):
    rows, c = x2d.shape
    itemsize = jnp.dtype(x2d.dtype).itemsize
    tile_rows = _choose_tile(rows, c * itemsize, _sublane_granule(x2d.dtype))
    grid = (pl.cdiv(rows, tile_rows),)
    w2 = weight.reshape(1, c)
    b2 = bias.reshape(1, c)
    return pl.pallas_call(
        functools.partial(_ln_rows_kernel, eps=eps),
        out_shape=jax.ShapeDtypeStruct((rows, c), x2d.dtype),
        grid_spec=pltpu.PrefetchScalarGridSpec(
            num_scalar_prefetch=0,
            grid=grid,
            in_specs=[
                pl.BlockSpec((tile_rows, c), lambda i: (i, 0)),
                pl.BlockSpec((1, c), lambda i: (0, 0)),
                pl.BlockSpec((1, c), lambda i: (0, 0)),
            ],
            out_specs=pl.BlockSpec((tile_rows, c), lambda i: (i, 0)),
        ),
        compiler_params=pltpu.CompilerParams(
            dimension_semantics=("parallel",),
            vmem_limit_bytes=_vmem_limit(),
        ),
    )(x2d, w2, b2)


def _layer_norm_packed(x2d, weight, bias, eps):
    """Lane-dense path for small C (C | 128 and rows*C % 128 == 0)."""
    rows, c = x2d.shape
    g = _LANES // c
    m = (rows * c) // _LANES
    xp = x2d.reshape(m, _LANES)                        # free: same contiguous bytes

    w_t = jnp.tile(weight.reshape(-1), g).reshape(1, _LANES)
    b_t = jnp.tile(bias.reshape(-1), g).reshape(1, _LANES)

    itemsize = jnp.dtype(x2d.dtype).itemsize
    tile_m = _choose_tile(m, _LANES * itemsize, _sublane_granule(x2d.dtype))
    grid = (pl.cdiv(m, tile_m),)
    out = pl.pallas_call(
        functools.partial(_ln_packed_kernel, eps=eps, c=c),
        out_shape=jax.ShapeDtypeStruct((m, _LANES), x2d.dtype),
        grid_spec=pltpu.PrefetchScalarGridSpec(
            num_scalar_prefetch=0,
            grid=grid,
            in_specs=[
                pl.BlockSpec((tile_m, _LANES), lambda i: (i, 0)),
                pl.BlockSpec((1, _LANES), lambda i: (0, 0)),
                pl.BlockSpec((1, _LANES), lambda i: (0, 0)),
            ],
            out_specs=pl.BlockSpec((tile_m, _LANES), lambda i: (i, 0)),
        ),
        compiler_params=pltpu.CompilerParams(
            dimension_semantics=("parallel",),
            vmem_limit_bytes=_vmem_limit(),
        ),
    )(xp, w_t, b_t)
    return out.reshape(rows, c)


def layer_norm_channels_last(x, weight, bias, eps=1e-6):
    """x: (..., C) -- normalize over the last dim (== F.layer_norm)."""
    shape = x.shape
    c = shape[-1]
    rows = 1
    for d in shape[:-1]:
        rows *= d
    x2d = x.reshape(rows, c)
    if c <= _PACKED_MAX_C and _LANES % c == 0 and (rows * c) % _LANES == 0:
        out = _layer_norm_packed(x2d, weight, bias, eps)
    else:
        # TODO(synk): C not a multiple of 128 (e.g. 160) stores at partial lane
        # density; pad C at the model level if such widths dominate.
        out = _layer_norm_rows(x2d, weight, bias, eps)
    return out.reshape(shape)


def layer_norm_channels_first(x, weight, bias, eps=1e-6):
    """x: (B, C, H, W) -- normalize over C (dim 1); weight/bias broadcast [C,1,1]."""
    b, c, h, w = x.shape
    hw = h * w
    itemsize = jnp.dtype(x.dtype).itemsize
    sub_g = _sublane_granule(x.dtype)

    if hw % _LANES == 0 and c * sub_g * _LANES * itemsize <= _block_budget():
        # Lane-dense: blocks (C, t, 128), C reduced with plain VPU adds.
        n128 = hw // _LANES
        x4 = x.reshape(b, c, n128, _LANES)
        tile_t = _choose_tile(n128, c * _LANES * itemsize, sub_g)
        grid = (b, pl.cdiv(n128, tile_t))
        w4 = weight.reshape(c, 1, 1)
        b4 = bias.reshape(c, 1, 1)
        out = pl.pallas_call(
            functools.partial(_ln_cf_lane_kernel, eps=eps),
            out_shape=jax.ShapeDtypeStruct((b, c, n128, _LANES), x.dtype),
            grid_spec=pltpu.PrefetchScalarGridSpec(
                num_scalar_prefetch=0,
                grid=grid,
                in_specs=[
                    pl.BlockSpec((None, c, tile_t, _LANES), lambda i, j: (i, 0, j, 0)),
                    pl.BlockSpec((c, 1, 1), lambda i, j: (0, 0, 0)),
                    pl.BlockSpec((c, 1, 1), lambda i, j: (0, 0, 0)),
                ],
                out_specs=pl.BlockSpec((None, c, tile_t, _LANES),
                                       lambda i, j: (i, 0, j, 0)),
            ),
            compiler_params=pltpu.CompilerParams(
                dimension_semantics=("parallel", "parallel"),
                vmem_limit_bytes=_vmem_limit(),
            ),
        )(x4, w4, b4)
        return out.reshape(b, c, h, w)

    # Fallback (HW not a multiple of 128): blocks (C, tile_hw), sublane reduce.
    x3 = x.reshape(b, c, hw)
    tile_hw = _choose_tile(hw, c * itemsize, _LANES)
    grid = (b, pl.cdiv(hw, tile_hw))
    w2 = weight.reshape(c, 1)
    b2 = bias.reshape(c, 1)
    out = pl.pallas_call(
        functools.partial(_ln_cols_kernel, eps=eps),
        out_shape=jax.ShapeDtypeStruct((b, c, hw), x.dtype),
        grid_spec=pltpu.PrefetchScalarGridSpec(
            num_scalar_prefetch=0,
            grid=grid,
            in_specs=[
                pl.BlockSpec((None, c, tile_hw), lambda i, j: (i, 0, j)),
                pl.BlockSpec((c, 1), lambda i, j: (0, 0)),
                pl.BlockSpec((c, 1), lambda i, j: (0, 0)),
            ],
            out_specs=pl.BlockSpec((None, c, tile_hw), lambda i, j: (i, 0, j)),
        ),
        compiler_params=pltpu.CompilerParams(
            dimension_semantics=("parallel", "parallel"),
            vmem_limit_bytes=_vmem_limit(),
        ),
    )(x3, w2, b2)
    return out.reshape(b, c, h, w)


def layer_norm(x, weight, bias, eps=1e-6, data_format="channels_last"):
    if data_format == "channels_last":
        return layer_norm_channels_last(x, weight, bias, eps)
    elif data_format == "channels_first":
        return layer_norm_channels_first(x, weight, bias, eps)
    raise ValueError(f"not support data format '{data_format}'")


# ----------------------------------------------------------------------------
# Pure-JAX references (match the PyTorch module's math)
# ----------------------------------------------------------------------------
def _ref_channels_first(x, weight, bias, eps):
    mean = jnp.mean(x, axis=1, keepdims=True)
    var = jnp.mean((x - mean) ** 2, axis=1, keepdims=True)
    xn = (x - mean) / jnp.sqrt(var + eps)
    return weight[None, :, None, None] * xn + bias[None, :, None, None]


def _ref_channels_last(x, weight, bias, eps):
    mean = jnp.mean(x, axis=-1, keepdims=True)
    var = jnp.mean((x - mean) ** 2, axis=-1, keepdims=True)
    xn = (x - mean) / jnp.sqrt(var + eps)
    return xn * weight + bias


if __name__ == "__main__":
    key = jax.random.PRNGKey(0)
    k1, k2, k3, k4, k5 = jax.random.split(key, 5)

    eps = 1e-6  # module default (note: differs from torch.nn.LayerNorm's 1e-5)

    B, C, H, W = 2, 4, 16, 16
    w_c = jax.random.normal(k3, (C,), dtype=jnp.float32)
    b_c = jax.random.normal(k4, (C,), dtype=jnp.float32) * 0.1

    # ---- channels_first, HW % 128 == 0: lane-dense (C, t, 128) kernel ----
    x_cf = jax.random.normal(k1, (B, C, H, W), dtype=jnp.float32)
    out_cf = jax.block_until_ready(layer_norm(x_cf, w_c, b_c, eps, "channels_first"))
    ref_cf = _ref_channels_first(x_cf, w_c, b_c, eps)
    assert out_cf.shape == (B, C, H, W)
    assert jnp.allclose(out_cf, ref_cf, atol=1e-5, rtol=1e-4)

    # ---- channels_first, HW % 128 != 0: fallback sublane-reduce kernel ----
    x_cf2 = jax.random.normal(k2, (B, C, 12, 12), dtype=jnp.float32)
    out_cf2 = jax.block_until_ready(layer_norm(x_cf2, w_c, b_c, eps, "channels_first"))
    ref_cf2 = _ref_channels_first(x_cf2, w_c, b_c, eps)
    assert jnp.allclose(out_cf2, ref_cf2, atol=1e-5, rtol=1e-4)

    # ---- channels_last, small C: packed lane-dense butterfly kernel ----
    x_cl = jax.random.normal(k2, (B, H, W, C), dtype=jnp.float32)
    out_cl = jax.block_until_ready(layer_norm(x_cl, w_c, b_c, eps, "channels_last"))
    ref_cl = _ref_channels_last(x_cl, w_c, b_c, eps)
    assert out_cl.shape == (B, H, W, C)
    assert jnp.allclose(out_cl, ref_cl, atol=1e-5, rtol=1e-4)

    # ---- channels_last, larger C (not a divisor of 128): generic rows kernel ----
    C2 = 160
    w2 = jax.random.normal(k5, (C2,), dtype=jnp.float32)
    b2 = jnp.zeros((C2,), dtype=jnp.float32)
    x_cl2 = jax.random.normal(k1, (2, 8, 8, C2), dtype=jnp.float32)
    out_cl2 = jax.block_until_ready(layer_norm(x_cl2, w2, b2, eps, "channels_last"))
    ref_cl2 = _ref_channels_last(x_cl2, w2, b2, eps)
    assert out_cl2.shape == (2, 8, 8, C2)
    assert jnp.allclose(out_cl2, ref_cl2, atol=1e-5, rtol=1e-4)

    print("KERNEL_OK")
</pallas_src>

<mosaic_0001>
module attributes {stable_mosaic.version = 11 : i64} {
  func.func @_ln_cf_lane_kernel(%arg0: i32, %arg1: i32, %arg2: memref<1x4x2x128xf32, #tpu.memory_space<vmem>>, %arg3: memref<4x1x1xf32, #tpu.memory_space<vmem>>, %arg4: memref<4x1x1xf32, #tpu.memory_space<vmem>>, %arg5: memref<1x4x2x128xf32, #tpu.memory_space<vmem>>) attributes {dimension_semantics = [#tpu.dimension_semantics<parallel>, #tpu.dimension_semantics<parallel>], iteration_bounds = array<i64: 2, 1>, scalar_prefetch = 0 : i64, scratch_operands = 0 : i64, tpu.core_type = #tpu.core_type<tc>, window_params = [{transform_indices = @transform_0, window_bounds = array<i64: 1, 4, 2, 128>}, {pipeline_mode = #tpu.pipeline_mode<synchronous>, transform_indices = @transform_1, window_bounds = array<i64: 4, 1, 1>}, {pipeline_mode = #tpu.pipeline_mode<synchronous>, transform_indices = @transform_2, window_bounds = array<i64: 4, 1, 1>}, {transform_indices = @transform_3, window_bounds = array<i64: 1, 4, 2, 128>}]} {
    %c0 = arith.constant 0 : index
    %c0_0 = arith.constant 0 : index
    %c0_1 = arith.constant 0 : index
    %c0_2 = arith.constant 0 : index
    %0 = vector.load %arg2[%c0, %c0_0, %c0_1, %c0_2] : memref<1x4x2x128xf32, #tpu.memory_space<vmem>>, vector<1x4x2x128xf32>
    %1 = vector.shape_cast %0 : vector<1x4x2x128xf32> to vector<4x2x128xf32>
    %cst = arith.constant dense<0.000000e+00> : vector<2x128xf32>
    %2 = vector.multi_reduction <add>, %1, %cst [0] : vector<4x2x128xf32> to vector<2x128xf32>
    %3 = vector.shape_cast %2 : vector<2x128xf32> to vector<1x2x128xf32>
    %cst_3 = arith.constant 4.000000e+00 : f32
    %4 = vector.broadcast %cst_3 : f32 to vector<1x2x128xf32>
    %5 = arith.divf %3, %4 : vector<1x2x128xf32>
    %6 = vector.broadcast %5 : vector<1x2x128xf32> to vector<4x2x128xf32>
    %7 = arith.subf %1, %6 : vector<4x2x128xf32>
    %8 = arith.mulf %7, %7 : vector<4x2x128xf32>
    %cst_4 = arith.constant dense<0.000000e+00> : vector<2x128xf32>
    %9 = vector.multi_reduction <add>, %8, %cst_4 [0] : vector<4x2x128xf32> to vector<2x128xf32>
    %10 = vector.shape_cast %9 : vector<2x128xf32> to vector<1x2x128xf32>
    %cst_5 = arith.constant 4.000000e+00 : f32
    %11 = vector.broadcast %cst_5 : f32 to vector<1x2x128xf32>
    %12 = arith.divf %10, %11 : vector<1x2x128xf32>
    %cst_6 = arith.constant 9.99999997E-7 : f32
    %13 = vector.broadcast %cst_6 : f32 to vector<1x2x128xf32>
    %14 = arith.addf %12, %13 : vector<1x2x128xf32>
    %15 = math.rsqrt %14 : vector<1x2x128xf32>
    %c0_7 = arith.constant 0 : index
    %c0_8 = arith.constant 0 : index
    %c0_9 = arith.constant 0 : index
    %16 = vector.load %arg3[%c0_7, %c0_8, %c0_9] : memref<4x1x1xf32, #tpu.memory_space<vmem>>, vector<4x1x1xf32>
    %c0_10 = arith.constant 0 : index
    %c0_11 = arith.constant 0 : index
    %c0_12 = arith.constant 0 : index
    %17 = vector.load %arg4[%c0_10, %c0_11, %c0_12] : memref<4x1x1xf32, #tpu.memory_space<vmem>>, vector<4x1x1xf32>
    %18 = vector.broadcast %15 : vector<1x2x128xf32> to vector<4x2x128xf32>
    %19 = arith.mulf %7, %18 : vector<4x2x128xf32>
    %20 = vector.broadcast %16 : vector<4x1x1xf32> to vector<4x2x128xf32>
    %21 = arith.mulf %19, %20 : vector<4x2x128xf32>
    %22 = vector.broadcast %17 : vector<4x1x1xf32> to vector<4x2x128xf32>
    %23 = arith.addf %21, %22 : vector<4x2x128xf32>
    %c0_13 = arith.constant 0 : index
    %c0_14 = arith.constant 0 : index
    %c0_15 = arith.constant 0 : index
    %c0_16 = arith.constant 0 : index
    %24 = vector.load %arg5[%c0_13, %c0_14, %c0_15, %c0_16] : memref<1x4x2x128xf32, #tpu.memory_space<vmem>>, vector<1x4x2x128xf32>
    %25 = vector.shape_cast %24 : vector<1x4x2x128xf32> to vector<4x2x128xf32>
    %26 = vector.shape_cast %23 : vector<4x2x128xf32> to vector<1x4x2x128xf32>
    tpu.vector_store %arg5[%c0_13, %c0_14, %c0_15, %c0_16], %26 {strides = array<i32>} : memref<1x4x2x128xf32, #tpu.memory_space<vmem>>, vector<1x4x2x128xf32>,
    return
  }
  func.func @transform_0(%arg0: i32, %arg1: i32) -> (i32, i32, i32, i32) {
    %c0_i32 = arith.constant 0 : i32
    %c0_i32_0 = arith.constant 0 : i32
    %c0_i32_1 = arith.constant 0 : i32
    return %arg0, %c0_i32, %arg1, %c0_i32_0 : i32, i32, i32, i32
  }
  func.func @transform_1(%arg0: i32, %arg1: i32) -> (i32, i32, i32) {
    %c0_i32 = arith.constant 0 : i32
    %c0_i32_0 = arith.constant 0 : i32
    %c0_i32_1 = arith.constant 0 : i32
    %c0_i32_2 = arith.constant 0 : i32
    return %c0_i32, %c0_i32_0, %c0_i32_1 : i32, i32, i32
  }
  func.func @transform_2(%arg0: i32, %arg1: i32) -> (i32, i32, i32) {
    %c0_i32 = arith.constant 0 : i32
    %c0_i32_0 = arith.constant 0 : i32
    %c0_i32_1 = arith.constant 0 : i32
    %c0_i32_2 = arith.constant 0 : i32
    return %c0_i32, %c0_i32_0, %c0_i32_1 : i32, i32, i32
  }
  func.func @transform_3(%arg0: i32, %arg1: i32) -> (i32, i32, i32, i32) {
    %c0_i32 = arith.constant 0 : i32
    %c0_i32_0 = arith.constant 0 : i32
    %c0_i32_1 = arith.constant 0 : i32
    return %arg0, %c0_i32, %arg1, %c0_i32_0 : i32, i32, i32, i32
  }
}

</mosaic_0001>

<bundles_post_ra>
// kernel: tpu_custom_call.1
= control target key start
LH: loop header
LB: loop body
LE: loop exit
PB: predicated region body
PF: predicated region fallthrough
CT: control target
= control target key end

     0   :  { %8 = vsyncpa [#allocation3], 0  ;;  %s831_s0 = inlined_call_operand.hbm [shape: f32[2,4,2,128], index: 0, kind: input, shape index: {}]   ;;  %s832_s1 = inlined_call_operand.vmem [shape: f32[4,1,1], index: 1, kind: input, shape index: {}]   ;;  %s833_s2 = inlined_call_operand.vmem [shape: f32[4,1,1], index: 2, kind: input, shape index: {}]   ;;  %s834_s3 = inlined_call_operand.hbm [shape: f32[2,4,2,128], index: 3, kind: output, shape index: {}]  }
   0x1   :  { %10 = vsyncpa [#allocation3 + $0x1], 0 }
   0x2   :  { %11 = vsyncpa [#allocation4], 0 }
   0x3   :  { %13 = vsyncpa [#allocation4 + $0x1], 0  ;;  %s669_s12 = smov 0   ;;  %s671_s13 = smov 0  }
   0x4   :  { %s673_s14 = smov 0   ;;  %s675_s15 = smov 0  }
   0x5   :  { %s677_s16 = smov 0   ;;  %s679_s17 = smov 0  }
   0x6 LB: > { %s429_s18 = sadd.s32 4294967295, %s641_s17   ;;  %s430_s19 = sadd.s32 4294967294, %s641_s17   ;;  %s641_s17 = sphi %s679_s17, %s19_s17   ;;  %s637_s16 = sphi %s677_s16, %s843_s16   ;;  %s633_s15 = sphi %s675_s15, %s842_s15   ;;  %s629_s14 = sphi %s673_s14, %s841_s14   ;;  %s625_s13 = sphi %s671_s13, %s840_s13   ;;  %s621_s12 = sphi %s669_s12, %s839_s12  }
   0x7   : > { %s31_s20 = sadd.s32 1, %s637_s16  ;;  %s40_s21 = sadd.s32 1, %s629_s14 }
   0x8   : > { %p33_p0 = scmp.ge.s32.totalorder %s31_s20, 2  ;;  %p47_p1 = scmp.ne.s32.totalorder %s629_s14, %s625_s13 }
   0x9   : > { %p48_p2 = scmp.eq.s32.totalorder %s641_s17, 0  ;;  %p53_p3 = scmp.ne.s32.totalorder %s625_s13, %s621_s12 }
   0xa   : > { %s845_s20 = smov (%p33_p0, %s31_s20), 0  ;;  %p54_p5 = scmp.eq.s32.totalorder %s429_s18, 0 }
   0xb   : > { %p710_p4 = por %p48_p2, %p47_p1  ;;  %s35_s23 = ssub.s32 %s637_s16, %s845_s20 }
   0xc   : > { %p121_p6 = scmp.eq.s32.totalorder %s429_s18, 1  ;;  %p38_p7 = scmp.eq.s32.totalorder %s35_s23, 0 }
   0xd   : > { %p716_p8 = por %p54_p5, %p53_p3  ;;  %p127_p10 = scmp.eq.s32.totalorder %s430_s19, 1 }
   0xe   : > { %p720_p9 = por %p121_p6, %p47_p1  ;;  %p432_p12 = scmp.ge.s32.totalorder %s641_s17, 2 }
   0xf   : > { %s725_s26 = scalar_select %p38_p7, %s629_s14, %s40_s21  }
  0x10   : > { %p727_p11 = por %p127_p10, %p53_p3  ;;  %p458_p13 = scmp.lt.s32.totalorder %s641_s17, 2 }
  0x11   : > { %s153_s28 = sand.u32 1, %s629_s14   ;;  %s444_s30 = sshll.u32 %s637_s16, 3 }
  0x12   : > { %s433_s29 = sshll.u32 %s153_s28, 3  ;;  %s163_s6 = scalar_lea.hbm %s831_s0, %s444_s30 }
  0x13   : > { %s157_s7 = scalar_lea.vmem [#allocation2], %s433_s29  ;;  %s164_s9 = sshll.u32 %s163_s6, 4  ;;  %s165_s9 = int_to_ptr.hbm [resolvable:$true] %s164_s9 }
  0x14   : > { %s166_s8 = sshll.u32 %s157_s7, 4  ;;  %p451_p0 = pnand %p458_p13, %p710_p4  ;;  %s167_s8 = int_to_ptr.vmem [resolvable:$true] %s166_s8 }
  0x15   : > { %p436_p1 = scmp.ge.s32.totalorder %s641_s17, 1  ;;  %s154_s10 = scalar_lea.sflag [#allocation3], %s153_s28 }
  0x16   : > { %s643_s11 = smov 32   ;;  %s644_s18 = smov 2  }
  0x17   : > { %453 = dma.hbm_to_vmem [thread:$0]  (!%p451_p0), %s165_s9, 128, %s167_s8, %s154_s10, %s643_s11, %s643_s11, %s644_s18  }
  0x18   : > { %p174_p2 = scmp.lt.s32.totalorder %s641_s17, 3 }
  0x1a   : > { %p175_p3 = pnand %p436_p1, %p174_p2 }
  0x1b   : > { %s743_s19 = sand.u32 (!%p175_p3), 1, %s625_s13  }
  0x1c   : > { %178 = sbr.rel (%p175_p3) target bundleno = 174 (0xae), region = 32  ;;  %s437_s21 = sshll.u32 (!%p175_p3), %s743_s19, 3 }
  0x1d   : > { %s181_s23 = scalar_lea.sflag (!%p175_p3), [#allocation3], %s743_s19  ;;  %s749_s22 = scalar_lea.vmem (!%p175_p3), [#allocation2], %s437_s21 }
  0x21   : > { %612 = dma.done.wait (%p716_p8), %s181_s23, 128  }
  0x22   : > { %614 = vsyncadd (%p716_p8), %s181_s23, 4294967168  ;;  %v645_v0 = vmov 0   ;;  %v517_v1 = vld [vmem:[%s832_s1 + $0x2] ss:$0 sm:$0xff]  ;;  %v518_v2 = vld [vmem:[%s832_s1] ss:$0 sm:$0xff] }
  0x23   : > { %515 = vset.pattern.permute.xlu1 %v645_v0  ;;  %514 = vset.pattern.permute.xlu0 %v645_v0  ;;  %v523_v3 = vld [vmem:[%s833_s2] ss:$0 sm:$0xff]  ;;  %v519_v4 = vld [vmem:[%s832_s1 + $0x3] ss:$0 sm:$0xff]  ;;  %v520_v5 = vld [vmem:[%s832_s1 + $0x1] ss:$0 sm:$0xff] }
  0x24   : > { %516 = vset.pattern.permute.xlu2 %v645_v0  ;;  %284 = vperm.xlu1 %515, %v517_v1   ;;  %v524_v6 = vld [vmem:[%s833_s2 + $0x1] ss:$0 sm:$0xff]  ;;  %v521_v7 = vld [vmem:[%s833_s2 + $0x3] ss:$0 sm:$0xff]  ;;  %v522_v8 = vld [vmem:[%s833_s2 + $0x2] ss:$0 sm:$0xff] }
  0x25   : > { %276 = vperm.xlu0 %514, %v518_v2   ;;  %304 = vperm.xlu2 %516, %v523_v3   ;;  %v646_v9 = vmov 4.0   ;;  %vm212_vm0 = vcmask 1041408   ;;  %v208_v12 = vld [vmem:[%s749_s22] sm:$0x3]  ;;  %v209_v13 = vld [vmem:[%s749_s22 + $0x2] sm:$0x3] }
  0x26   : > { %525 = vrcp.f32 %v646_v9  ;;  %v213_v15 = vsel %vm212_vm0, %v208_v12, 0.0  ;;  %v214_v16 = vsel %vm212_vm0, %v209_v13, 0.0  ;;  %v210_v17 = vld [vmem:[%s749_s22 + $0x4] sm:$0x3]  ;;  %v211_v21 = vld [vmem:[%s749_s22 + $0x6] sm:$0x3] }
  0x27   : > { %v215_v18 = vadd.f32 %v214_v16, %v213_v15  ;;  %v216_v20 = vsel %vm212_vm0, %v210_v17, 0.0  ;;  %v218_v24 = vsel %vm212_vm0, %v211_v21, 0.0  ;;  %s207_s22 = scalar_lea.vmem [#allocation5], %s437_s21  ;;  %s445_s30 = sshll.u32 %s633_s15, 3 }
  0x28   : > { %s340_s6 = scalar_lea.hbm %s834_s3, %s445_s30  ;;  %s341_s24 = sshll.u32 %s207_s22, 4  ;;  %s342_s24 = int_to_ptr.vmem [resolvable:$true] %s341_s24 }
  0x29   : > { %v217_v22 = vadd.f32 %v216_v20, %v215_v18  ;;  %s343_s7 = sshll.u32 %s340_s6, 4  ;;  %s328_s15 = scalar_lea.sflag [#allocation4], %s743_s19  ;;  %s344_s7 = int_to_ptr.hbm [resolvable:$true] %s343_s7 }
  0x2a   : > { %s573_s21 = sshra.s32 %s344_s7, 4  ;;  %s579_s11 = scalar_lea.hbm %s834_s3, 16  ;;  %s574_s21 = int_to_ptr.hbm [resolvable:$true] %s573_s21 }
  0x2b   : > { %v219_v25 = vadd.f32 %v218_v24, %v217_v22  ;;  %s575_s8 = scalar_lea.hbm %s574_s21, 8  ;;  %p580_p7 = scmp.lt.s32.totalorder %s574_s21, %s834_s3 }
  0x2c   : > { %288 = vperm.xlu1 %515, %v519_v4   ;;  %v526_v10 = vpop.eup %525  ;;  %p576_p4 = scmp.ne.s32.totalorder %s574_s21, %s575_s8  ;;  %p581_p8 = scmp.lt.s32.totalorder %s579_s11, %s575_s8 }
  0x2d   : > { %280 = vperm.xlu0 %514, %v520_v5   ;;  %308 = vperm.xlu2 %516, %v524_v6   ;;  %v221_v11 = vmul.f32 4.0, %v526_v10  ;;  %vm225_vm1 = vweird.f32 %v526_v10 }
  0x2e   : > { %p577_p5 = pnand %p576_p4, %p720_p9  ;;  %p582_p10 = por %p581_p8, %p580_p7 }
  0x2f   : > { %v222_v14 = vsub.f32 1.0, %v221_v11 }
  0x30   : > { %p578_p6 = pneg %p577_p5 }
  0x31   : > { %v223_v19 = vmul.f32 %v526_v10, %v222_v14 }
  0x32   : > { %p583_p13 = pnand %p582_p10, %p578_p6 }
  0x33   : > { %v224_v23 = vadd.f32 %v526_v10, %v223_v19 }
  0x34   : > { %316 = vperm.xlu1 %515, %v521_v7  }
  0x35   : > { %312 = vperm.xlu0 %514, %v522_v8   ;;  %v226_v26 = vsel %vm225_vm1, %v526_v10, %v224_v23 }
  0x36   : > { %v227_v27 = vmul.f32 %v226_v26, %v219_v25 }
  0x38   : > { %v228_v28 = vsub.f32 %v208_v12, %v227_v27  ;;  %v229_v29 = vsub.f32 %v209_v13, %v227_v27  ;;  %v230_v30 = vsub.f32 %v210_v17, %v227_v27  ;;  %v231_v33 = vsub.f32 %v211_v21, %v227_v27 }
  0x3a   : > { %v232_v31 = vmul.f32 %v228_v28, %v228_v28  ;;  %v233_v32 = vmul.f32 %v229_v29, %v229_v29  ;;  %v234_v34 = vmul.f32 %v230_v30, %v230_v30  ;;  %v235_v38 = vmul.f32 %v231_v33, %v231_v33 }
  0x3c   : > { %v236_v35 = vsel %vm212_vm0, %v232_v31, 0.0  ;;  %v237_v36 = vsel %vm212_vm0, %v233_v32, 0.0  ;;  %v239_v39 = vsel %vm212_vm0, %v234_v34, 0.0  ;;  %v241_v41 = vsel %vm212_vm0, %v235_v38, 0.0 }
  0x3d   : > { %v238_v37 = vadd.f32 %v237_v36, %v236_v35 }
  0x3f   : > { %v240_v40 = vadd.f32 %v239_v39, %v238_v37 }
  0x41   : > { %v242_v42 = vadd.f32 %v241_v41, %v240_v40 }
  0x43   : > { %v243_v43 = vmul.f32 %v242_v42, %v226_v26 }
  0x45   : > { %v244_v44 = vadd.f32 1e-06, %v243_v43 }
  0x47   : > { %527 = vrsqrt.f32 %v244_v44  ;;  %vm251_vm2 = vweird.f32 %v244_v44 }
  0x4d   : > { %v528_v45 = vpop.eup %527 }
  0x4e   : > { %v246_v46 = vmul.f32 %v528_v45, %v244_v44  ;;  %vm252_vm3 = vweird.f32 %v528_v45 }
  0x4f   : > { %vm253_vm4 = vmor %vm251_vm2, %vm252_vm3 }
  0x50   : > { %v247_v47 = vmul.f32 %v528_v45, %v246_v46 }
  0x52   : > { %v248_v48 = vmul.f32 0.5, %v247_v47 }
  0x54   : > { %v249_v49 = vsub.f32 1.5, %v248_v48 }
  0x56   : > { %v250_v50 = vmul.f32 %v528_v45, %v249_v49 }
  0x58   : > { %v254_v51 = vsel %vm253_vm4, %v528_v45, %v250_v50 }
  0x59   : > { %v263_v52 = vmul.f32 %v254_v51, %v228_v28  ;;  %v264_v58 = vmul.f32 %v254_v51, %v229_v29  ;;  %v266_v63 = vmul.f32 %v254_v51, %v231_v33  ;;  %v265_v0 = vmul.f32 %v254_v51, %v230_v30 }
  0x7f   : > { %v305_v54 = vpop.permute.xlu2 %304 }
  0x87   : > { %v309_v62 = vpop.permute.xlu2 %308 }
  0x96   : > { %v285_v53 = vpop.permute.xlu1 %284 }
  0x97   : > { %v277_v55 = vpop.permute.xlu0 %276  ;;  %v293_v3 = vmul.f32 %v285_v53, %v265_v0 }
  0x98   : > { %v291_v56 = vmul.f32 %v277_v55, %v263_v52 }
  0x9a   : > { %v319_v57 = vadd.f32 %v305_v54, %v291_v56 }
  0x9c   : > { %323 = vst [vmem:[%s207_s22] sm:$0x3] %v319_v57 }
  0x9e   : > { %v289_v59 = vpop.permute.xlu1 %288 }
  0x9f   : > { %v281_v60 = vpop.permute.xlu0 %280  ;;  %v294_v2 = vmul.f32 %v289_v59, %v266_v63 }
  0xa0   : > { %v292_v61 = vmul.f32 %v281_v60, %v264_v58 }
  0xa2   : > { %v320_v1 = vadd.f32 %v309_v62, %v292_v61 }
  0xa4   : > { %324 = vst [vmem:[%s207_s22 + $0x2] sm:$0x3] %v320_v1 }
  0xa6   : > { %v317_v4 = vpop.permute.xlu1 %316 }
  0xa7   : > { %v322_v5 = vadd.f32 %v317_v4, %v294_v2  ;;  %v313_v6 = vpop.permute.xlu0 %312 }
  0xa8   : > { %v321_v7 = vadd.f32 %v313_v6, %v293_v3 }
  0xa9   : > { %326 = vst [vmem:[%s207_s22 + $0x6] sm:$0x3] %v322_v5 }
  0xaa   : > { %325 = vst [vmem:[%s207_s22 + $0x4] sm:$0x3] %v321_v7 }
  0xab   : > { %586 = shalt.err (!%p583_p13)
}
  0xac   : > { %s647_s19 = smov 32   ;;  %s648_s28 = smov 2  }
  0xad   : > { %448 = dma.vmem_to_hbm [thread:$0]  (%p720_p9), %s342_s24, 128, %s344_s7, %s328_s15, %s647_s19, %s647_s19, %s648_s28  }
  0xae PF: > { %s358_s29 = sand.u32 1, %s621_s12   ;;  %p455_p0 = pnand %p432_p12, %p727_p11 }
  0xaf   : > { %s359_s22 = scalar_lea.sflag [#allocation4], %s358_s29 }
  0xb0   : > { %p456_p1 = pneg %p455_p0 }
  0xb2   : > { %616 = dma.done.wait (%p456_p1), %s359_s22, 128  }
  0xb3   : > { %618 = vsyncadd (%p456_p1), %s359_s22, 4294967168  ;;  %s19_s17 = sadd.s32 1, %s641_s17   ;;  %s839_s12 = smov %s625_s13 }
  0xb4   : > { %p16_p2 = scmp.ge.s32.totalorder %s19_s17, 4   ;;  %s840_s13 = smov %s629_s14 }
  0xb5   : > { %s841_s14 = smov %s725_s26  ;;  %s842_s15 = smov %s637_s16 }
  0xb6   : > { %s843_s16 = smov %s845_s20  ;;  %18 = sbr.rel (!%p16_p2) target bundleno = 6 (0x6), region = 77 }
  0xbb   :  { %365 = vsyncpa [#allocation3], 1 }
  0xbc   :  { %367 = vsyncpa [#allocation3 + $0x1], 1 }
  0xbd   :  { %368 = vsyncpa [#allocation4], 1 }
  0xbe   :  { %370 = vsyncpa [#allocation4 + $0x1], 1 }

</bundles_post_ra>
